<compile_context>
chip_gen: v6e
topology: v6e:2x2x1
jax: 0.10.0
libtpu: 0.0.40
codegen_flags: <defaults>
</compile_context>

<pallas_src>
import math

import jax
import jax.numpy as jnp
from jax.experimental import pallas as pl
from jax.experimental.pallas import tpu as pltpu

_SQRT_2_OVER_PI = math.sqrt(2.0 / math.pi)
_C1 = _SQRT_2_OVER_PI * 0.044715  # fold the 0.044715 factor into the constant


def _gelu_kernel(x_ref, o_ref):
    # Upcast to f32 for the cubic + tanh (free here: kernel is HBM-bound).
    x = x_ref[...].astype(jnp.float32)
    inner = x * (_SQRT_2_OVER_PI + _C1 * x * x)          # Horner form
    y = 0.5 * x * (1.0 + jnp.tanh(inner))
    o_ref[...] = y.astype(o_ref.dtype)


def gelu(x: jax.Array, *, target_block_bytes: int = 2 * 1024 * 1024) -> jax.Array:
    """Applies GELU (tanh approximation) elementwise; same shape/dtype as x."""
    orig_shape = x.shape
    dtype = x.dtype
    n = x.size
    lanes = 128
    itemsize = jnp.dtype(dtype).itemsize
    # Packed-sublane multiple: 8 (f32), 16 (bf16/f16), 32 (int8/fp8).
    sublane = max(8, 32 // itemsize)

    x_flat = x.reshape(-1)
    needs_pad = (n % lanes) != 0
    if needs_pad:
        # Rare fallback: only pad to the next multiple of 128 lanes.
        n_pad = pl.cdiv(n, lanes) * lanes
        x_flat = jnp.pad(x_flat, (0, n_pad - n))
    else:
        n_pad = n

    rows = n_pad // lanes
    x2d = x_flat.reshape(rows, lanes)

    # Pick a block of ~target_block_bytes (but never larger than the array).
    bytes_per_row = lanes * itemsize
    desired_rows = max(sublane, target_block_bytes // bytes_per_row)
    if desired_rows >= rows:
        block_rows = rows  # single full-extent block (always legal)
    else:
        block_rows = max(sublane, (desired_rows // sublane) * sublane)

    grid = (pl.cdiv(rows, block_rows),)

    out2d = pl.pallas_call(
        _gelu_kernel,
        out_shape=jax.ShapeDtypeStruct((rows, lanes), dtype),
        grid_spec=pltpu.PrefetchScalarGridSpec(
            num_scalar_prefetch=0,
            grid=grid,
            in_specs=[pl.BlockSpec((block_rows, lanes), lambda i: (i, 0))],
            out_specs=pl.BlockSpec((block_rows, lanes), lambda i: (i, 0)),
        ),
        compiler_params=pltpu.CompilerParams(
            dimension_semantics=("parallel",),
        ),
    )(x2d)

    out_flat = out2d.reshape(-1)
    if needs_pad:
        out_flat = out_flat[:n]
    return out_flat.reshape(orig_shape)


def _gelu_ref(x):
    xf = x.astype(jnp.float32)
    y = 0.5 * xf * (1.0 + jnp.tanh(_SQRT_2_OVER_PI * (xf + 0.044715 * xf ** 3)))
    return y.astype(x.dtype)


if __name__ == "__main__":
    key = jax.random.PRNGKey(0)

    # Primary test: shape consistent with the module's usage (no-pad fast path).
    x = jax.random.normal(key, (2, 4, 16, 16), dtype=jnp.float32)
    y = gelu(x)
    jax.block_until_ready(y)
    y_ref = _gelu_ref(x)
    assert y.shape == x.shape and y.dtype == x.dtype
    assert jnp.allclose(y, y_ref, atol=1e-5, rtol=1e-5)

    # Secondary test: odd element count exercises the pad fallback path.
    x2 = jax.random.normal(jax.random.PRNGKey(1), (2, 3), dtype=jnp.float32)
    y2 = gelu(x2)
    jax.block_until_ready(y2)
    assert y2.shape == x2.shape and y2.dtype == x2.dtype
    assert jnp.allclose(y2, _gelu_ref(x2), atol=1e-5, rtol=1e-5)

    print("KERNEL_OK")
</pallas_src>

<mosaic_0001>
module attributes {stable_mosaic.version = 11 : i64} {
  func.func @_gelu_kernel(%arg0: i32, %arg1: memref<16x128xf32, #tpu.memory_space<vmem>>, %arg2: memref<16x128xf32, #tpu.memory_space<vmem>>) attributes {dimension_semantics = [#tpu.dimension_semantics<parallel>], iteration_bounds = array<i64: 1>, scalar_prefetch = 0 : i64, scratch_operands = 0 : i64, tpu.core_type = #tpu.core_type<tc>, window_params = [{transform_indices = @transform_0, window_bounds = array<i64: 16, 128>}, {transform_indices = @transform_1, window_bounds = array<i64: 16, 128>}]} {
    %c0 = arith.constant 0 : index
    %c0_0 = arith.constant 0 : index
    %0 = vector.load %arg1[%c0, %c0_0] : memref<16x128xf32, #tpu.memory_space<vmem>>, vector<16x128xf32>
    %cst = arith.constant 0.0356774069 : f32
    %1 = vector.broadcast %cst : f32 to vector<16x128xf32>
    %2 = arith.mulf %1, %0 : vector<16x128xf32>
    %3 = arith.mulf %2, %0 : vector<16x128xf32>
    %cst_1 = arith.constant 0.797884583 : f32
    %4 = vector.broadcast %cst_1 : f32 to vector<16x128xf32>
    %5 = arith.addf %4, %3 : vector<16x128xf32>
    %6 = arith.mulf %0, %5 : vector<16x128xf32>
    %cst_2 = arith.constant 5.000000e-01 : f32
    %7 = vector.broadcast %cst_2 : f32 to vector<16x128xf32>
    %8 = arith.mulf %7, %0 : vector<16x128xf32>
    %9 = math.tanh %6 : vector<16x128xf32>
    %cst_3 = arith.constant 1.000000e+00 : f32
    %10 = vector.broadcast %cst_3 : f32 to vector<16x128xf32>
    %11 = arith.addf %10, %9 : vector<16x128xf32>
    %12 = arith.mulf %8, %11 : vector<16x128xf32>
    %c0_4 = arith.constant 0 : index
    %c0_5 = arith.constant 0 : index
    %13 = vector.load %arg2[%c0_4, %c0_5] : memref<16x128xf32, #tpu.memory_space<vmem>>, vector<16x128xf32>
    tpu.vector_store %arg2[%c0_4, %c0_5], %12 {strides = array<i32>} : memref<16x128xf32, #tpu.memory_space<vmem>>, vector<16x128xf32>,
    return
  }
  func.func @transform_0(%arg0: i32) -> (i32, i32) {
    %c0_i32 = arith.constant 0 : i32
    %c0_i32_0 = arith.constant 0 : i32
    return %arg0, %c0_i32 : i32, i32
  }
  func.func @transform_1(%arg0: i32) -> (i32, i32) {
    %c0_i32 = arith.constant 0 : i32
    %c0_i32_0 = arith.constant 0 : i32
    return %arg0, %c0_i32 : i32, i32
  }
}

</mosaic_0001>

<bundles_post_ra>
// kernel: tpu_custom_call.1
= control target key start
LH: loop header
LB: loop body
LE: loop exit
PB: predicated region body
PF: predicated region fallthrough
CT: control target
= control target key end

     0   :  { %6 = vsyncpa [#allocation3], 0  ;;  %s138_s0 = inlined_call_operand.hbm [shape: f32[16,128], index: 0, kind: input, shape index: {}]   ;;  %s139_s1 = inlined_call_operand.hbm [shape: f32[16,128], index: 1, kind: output, shape index: {}]  }
   0x1   :  { %7 = vsyncpa [#allocation4], 0  ;;  %s112_s6 = smov [#allocation2]  }
   0x2   :  { %s13_s7 = sshll.u32 %s112_s6, 4  ;;  %s14_s7 = int_to_ptr.vmem [resolvable:$true] %s13_s7 }
   0x3   :  { %s76_s8 = scalar_lea.vmem %s14_s7, 256  ;;  %p81_p1 = scmp.lt.s32.totalorder %s14_s7, %s14_s7 }
   0x4   :  { %p77_p0 = scmp.ne.s32.totalorder %s14_s7, %s76_s8  ;;  %p82_p2 = scmp.lt.s32.totalorder %s76_s8, %s76_s8 }
   0x6   :  { %p83_p3 = por %p82_p2, %p81_p1 }
   0x8   :  { %p84_p4 = pnand %p83_p3, %p77_p0 }
   0xa   :  { %87 = shalt.err (!%p84_p4)
}
   0xb   :  { %s113_s9 = smov 128   ;;  %s114_s10 = smov 8  }
   0xc   :  { %19 = dma.hbm_to_vmem [thread:$0]  %s138_s0, 256, %s14_s7, [#allocation3], %s113_s9, %s113_s9, %s114_s10  }
   0xd   :  { %108 = dma.done.wait [#allocation3], 256  }
   0xe   :  { %109 = vsyncadd [#allocation3], 4294967040  ;;  %v23_v0 = vld [vmem:[#allocation2] sm:$0xff]  ;;  %v24_v1 = vld [vmem:[#allocation2 + $0x8] sm:$0xff]  ;;  %s115_s0 = smov [#allocation5]  }
   0xf   :  { %v25_v2 = vmul.f32 0.035677407, %v23_v0  ;;  %v26_v3 = vmul.f32 0.035677407, %v24_v1  ;;  %v33_v10 = vmul.f32 0.5, %v23_v0  ;;  %v34_v12 = vmul.f32 0.5, %v24_v1 }
  0x10   :  { %s48_s13 = sshll.u32 %s115_s0, 4  ;;  %s49_s13 = int_to_ptr.vmem [resolvable:$true] %s48_s13 }
  0x11   :  { %v27_v4 = vmul.f32 %v25_v2, %v23_v0  ;;  %v28_v5 = vmul.f32 %v26_v3, %v24_v1  ;;  %s88_s14 = scalar_lea.vmem %s49_s13, 256  ;;  %p93_p6 = scmp.lt.s32.totalorder %s49_s13, %s49_s13 }
  0x12   :  { %p89_p5 = scmp.ne.s32.totalorder %s49_s13, %s88_s14  ;;  %p94_p7 = scmp.lt.s32.totalorder %s88_s14, %s88_s14 }
  0x13   :  { %v29_v6 = vadd.f32 0.7978846, %v27_v4  ;;  %v30_v7 = vadd.f32 0.7978846, %v28_v5 }
  0x14   :  { %p95_p8 = por %p94_p7, %p93_p6 }
  0x15   :  { %v31_v8 = vmul.f32 %v29_v6, %v23_v0  ;;  %v32_v9 = vmul.f32 %v30_v7, %v24_v1 }
  0x16   :  { %p96_p9 = pnand %p95_p8, %p89_p5 }
  0x17   :  { %64 = vtanh.f32 %v31_v8 }
  0x18   :  { %66 = vtanh.f32 %v32_v9 }
  0x24   :  { %v65_v11 = vpop.eup %64 }
  0x25   :  { %v67_v13 = vpop.eup %66  ;;  %v37_v14 = vadd.f32 1.0, %v65_v11 }
  0x26   :  { %v38_v15 = vadd.f32 1.0, %v67_v13 }
  0x27   :  { %v39_v16 = vmul.f32 %v37_v14, %v33_v10 }
  0x28   :  { %v40_v17 = vmul.f32 %v38_v15, %v34_v12 }
  0x29   :  { %41 = vst [vmem:[#allocation5] sm:$0xff] %v39_v16 }
  0x2a   :  { %42 = vst [vmem:[#allocation5 + $0x8] sm:$0xff] %v40_v17 }
  0x2b   :  { %99 = shalt.err (!%p96_p9)
}
  0x2c   :  { %54 = dma.vmem_to_hbm [thread:$0]  %s49_s13, 256, %s139_s1, [#allocation4], %s113_s9, %s113_s9, %s114_s10  }
  0x2d   :  { %110 = dma.done.wait [#allocation4], 256  }
  0x2e   :  { %111 = vsyncadd [#allocation4], 4294967040 }
  0x2f   :  { %58 = vsyncpa [#allocation3], 1 }
  0x30   :  { %59 = vsyncpa [#allocation4], 1 }

</bundles_post_ra>
